<compile_context>
chip_gen: v7x
topology: tpu7x:2x2x1
jax: 0.10.0
libtpu: 0.0.40
codegen_flags: <defaults>
</compile_context>

<pallas_src>
import math

import jax
import jax.numpy as jnp
from jax import lax
from jax.experimental import pallas as pl
from jax.experimental.pallas import tpu as pltpu


def _lora_linear_kernel(x_ref, w_ref, b_ref, a_ref, bt_ref, o_ref,
                        acc_ref, xa_ref):
    k = pl.program_id(2)

    @pl.when(k == 0)
    def _init():
        acc_ref[...] = jnp.zeros_like(acc_ref)
        xa_ref[...] = jnp.zeros_like(xa_ref)

    x = x_ref[...]                                          # (tm, tk)

    # Frozen path partial sum: x (tm, tk) . W (tn, tk), contract trailing K.
    acc_ref[...] += lax.dot_general(
        x, w_ref[...], (((1,), (1,)), ((), ())),
        preferred_element_type=jnp.float32)

    # LoRA A-projection partial sum: x (tm, tk) . A (r, tk), contract K.
    xa_ref[...] += lax.dot_general(
        x, a_ref[...], (((1,), (1,)), ((), ())),
        preferred_element_type=jnp.float32)

    @pl.when(k == pl.num_programs(2) - 1)
    def _finalize():
        # Low-rank update: (tm, r) @ (r, tn); scaling already folded into bt.
        lora = jnp.dot(xa_ref[...].astype(bt_ref.dtype), bt_ref[...],
                       preferred_element_type=jnp.float32)
        o_ref[...] = (acc_ref[...] + lora + b_ref[...]).astype(o_ref.dtype)


def _pad_axis(arr, axis, multiple):
    pad = (-arr.shape[axis]) % multiple
    if pad == 0:
        return arr
    widths = [(0, 0)] * arr.ndim
    widths[axis] = (0, pad)
    return jnp.pad(arr, widths)


def lora_linear(x, weight, bias, lora_A, lora_B, *, alpha=1.0,
                tm=256, tn=256, tk=512):
    """x: (..., in_features) -> (..., out_features)."""
    orig_shape = x.shape
    K = orig_shape[-1]
    N, _ = weight.shape
    rank = lora_A.shape[0]
    scaling = float(alpha) / float(rank)

    x2d = x.reshape(-1, K)
    M = x2d.shape[0]

    if bias is None:
        bias = jnp.zeros((N,), dtype=weight.dtype)

    # Fold scaling into B once and transpose so its lane dim is N (lane-dense).
    bt = (lora_B * scaling).T                               # (rank, N)
    bias2d = bias.reshape(1, N)

    # Clamp tiles for small problems (block == full dim is always legal),
    # then zero-pad every array up to tile multiples.
    tm = min(tm, M)
    tn = min(tn, N)
    tk = min(tk, K)
    rp = rank + ((-rank) % 8)                               # sublane-align rank

    xp = _pad_axis(_pad_axis(x2d, 0, tm), 1, tk)
    wp = _pad_axis(_pad_axis(weight, 0, tn), 1, tk)
    bp = _pad_axis(bias2d, 1, tn)
    ap = _pad_axis(_pad_axis(lora_A, 0, rp), 1, tk)
    btp = _pad_axis(_pad_axis(bt, 0, rp), 1, tn)

    Mp, Kp = xp.shape
    Np = wp.shape[0]
    grid = (Mp // tm, Np // tn, Kp // tk)

    out = pl.pallas_call(
        _lora_linear_kernel,
        out_shape=jax.ShapeDtypeStruct((Mp, Np), x.dtype),
        grid_spec=pltpu.PrefetchScalarGridSpec(
            num_scalar_prefetch=0,
            grid=grid,
            in_specs=[
                pl.BlockSpec((tm, tk), lambda i, j, k: (i, k)),   # x
                pl.BlockSpec((tn, tk), lambda i, j, k: (j, k)),   # W
                pl.BlockSpec((1, tn), lambda i, j, k: (0, j)),    # bias
                pl.BlockSpec((rp, tk), lambda i, j, k: (0, k)),   # lora_A
                pl.BlockSpec((rp, tn), lambda i, j, k: (0, j)),   # (lora_B*s)^T
            ],
            out_specs=pl.BlockSpec((tm, tn), lambda i, j, k: (i, j)),
            scratch_shapes=[
                pltpu.VMEM((tm, tn), jnp.float32),   # frozen-path accumulator
                pltpu.VMEM((tm, rp), jnp.float32),   # x @ A^T accumulator
            ],
        ),
        compiler_params=pltpu.CompilerParams(
            dimension_semantics=("parallel", "parallel", "arbitrary"),
            vmem_limit_bytes=32 * 1024 * 1024,
        ),
    )(xp, wp, bp, ap, btp)

    return out[:M, :N].reshape(*orig_shape[:-1], N)


def _reference(x, weight, bias, lora_A, lora_B, *, alpha=1.0):
    scaling = float(alpha) / float(lora_A.shape[0])
    frozen = x @ weight.T + bias
    lora = (x @ lora_A.T) @ lora_B.T * scaling
    return frozen + lora


def _make_inputs(key, batch, seq, in_features, out_features, rank):
    k_x, k_w, k_b, k_a, k_bb = jax.random.split(key, 5)
    x = jax.random.normal(k_x, (batch, seq, in_features), dtype=jnp.float32)
    w_bound = 1.0 / math.sqrt(in_features)
    weight = jax.random.uniform(k_w, (out_features, in_features),
                                minval=-w_bound, maxval=w_bound,
                                dtype=jnp.float32)
    bias = jax.random.uniform(k_b, (out_features,),
                              minval=-w_bound, maxval=w_bound,
                              dtype=jnp.float32)
    a_bound = math.sqrt(3.0) * math.sqrt(2.0 / 6.0) / math.sqrt(in_features)
    lora_A = jax.random.uniform(k_a, (rank, in_features),
                                minval=-a_bound, maxval=a_bound,
                                dtype=jnp.float32)
    # NOTE: the module inits lora_B to zeros; use small random values so the
    # low-rank path is actually exercised numerically.
    lora_B = 0.1 * jax.random.normal(k_bb, (out_features, rank),
                                     dtype=jnp.float32)
    return x, weight, bias, lora_A, lora_B


if __name__ == "__main__":
    key = jax.random.PRNGKey(0)
    k_small, k_big = jax.random.split(key, 2)

    # Small shapes consistent with an nn.Linear(32, 32) wrapped by
    # LoRALinear(rank=4, alpha=1.0); batch=2, seq=4.
    x, w, b, la, lb = _make_inputs(k_small, batch=2, seq=4,
                                   in_features=32, out_features=32, rank=4)
    out = jax.block_until_ready(lora_linear(x, w, b, la, lb, alpha=1.0))
    ref = _reference(x, w, b, la, lb, alpha=1.0)
    assert out.shape == (2, 4, 32)
    assert jnp.allclose(out, ref, atol=1e-5, rtol=1e-5), "small-shape mismatch"

    # Medium shapes that exercise the multi-tile grid, K accumulation and
    # padding paths (M=512 -> 2 M-tiles, N=384 -> padded, K=640 -> 2 K-tiles).
    x2, w2, b2, la2, lb2 = _make_inputs(k_big, batch=4, seq=128,
                                        in_features=640, out_features=384,
                                        rank=4)
    out2 = jax.block_until_ready(lora_linear(x2, w2, b2, la2, lb2, alpha=1.0))
    ref2 = _reference(x2, w2, b2, la2, lb2, alpha=1.0)
    assert out2.shape == (4, 128, 384)
    assert jnp.allclose(out2, ref2, atol=1e-3, rtol=1e-3), "tiled-shape mismatch"

    print("KERNEL_OK")
</pallas_src>

<mosaic_0001>
module attributes {stable_mosaic.version = 11 : i64} {
  func.func @_lora_linear_kernel(%arg0: i32, %arg1: i32, %arg2: i32, %arg3: memref<8x32xf32, #tpu.memory_space<vmem>>, %arg4: memref<32x32xf32, #tpu.memory_space<vmem>>, %arg5: memref<1x32xf32, #tpu.memory_space<vmem>>, %arg6: memref<8x32xf32, #tpu.memory_space<vmem>>, %arg7: memref<8x32xf32, #tpu.memory_space<vmem>>, %arg8: memref<8x32xf32, #tpu.memory_space<vmem>>, %arg9: memref<8x32xf32, #tpu.memory_space<vmem>>, %arg10: memref<8x8xf32, #tpu.memory_space<vmem>>) attributes {dimension_semantics = [#tpu.dimension_semantics<parallel>, #tpu.dimension_semantics<parallel>, #tpu.dimension_semantics<arbitrary>], iteration_bounds = array<i64: 1, 1, 1>, scalar_prefetch = 0 : i64, scratch_operands = 2 : i64, tpu.core_type = #tpu.core_type<tc>, window_params = [{transform_indices = @transform_0, window_bounds = array<i64: 8, 32>}, {transform_indices = @transform_1, window_bounds = array<i64: 32, 32>}, {transform_indices = @transform_2, window_bounds = array<i64: 1, 32>}, {transform_indices = @transform_3, window_bounds = array<i64: 8, 32>}, {transform_indices = @transform_4, window_bounds = array<i64: 8, 32>}, {transform_indices = @transform_5, window_bounds = array<i64: 8, 32>}]} {
    %c0_i32 = arith.constant 0 : i32
    %0 = arith.cmpi eq, %arg2, %c0_i32 : i32
    %1 = arith.extui %0 : i1 to i32
    %c0_i32_0 = arith.constant 0 : i32
    %2 = arith.cmpi ne, %1, %c0_i32_0 : i32
    scf.if %2 {
      %cst_17 = arith.constant 0.000000e+00 : f32
      %17 = vector.broadcast %cst_17 : f32 to vector<8x32xf32>
      %c0_18 = arith.constant 0 : index
      %c0_19 = arith.constant 0 : index
      %18 = vector.load %arg9[%c0_18, %c0_19] : memref<8x32xf32, #tpu.memory_space<vmem>>, vector<8x32xf32>
      tpu.vector_store %arg9[%c0_18, %c0_19], %17 {strides = array<i32>} : memref<8x32xf32, #tpu.memory_space<vmem>>, vector<8x32xf32>,
      %cst_20 = arith.constant 0.000000e+00 : f32
      %19 = vector.broadcast %cst_20 : f32 to vector<8x8xf32>
      %c0_21 = arith.constant 0 : index
      %c0_22 = arith.constant 0 : index
      %20 = vector.load %arg10[%c0_21, %c0_22] : memref<8x8xf32, #tpu.memory_space<vmem>>, vector<8x8xf32>
      tpu.vector_store %arg10[%c0_21, %c0_22], %19 {strides = array<i32>} : memref<8x8xf32, #tpu.memory_space<vmem>>, vector<8x8xf32>,
    } else {
    }
    %c0 = arith.constant 0 : index
    %c0_1 = arith.constant 0 : index
    %3 = vector.load %arg3[%c0, %c0_1] : memref<8x32xf32, #tpu.memory_space<vmem>>, vector<8x32xf32>
    %c0_2 = arith.constant 0 : index
    %c0_3 = arith.constant 0 : index
    %4 = vector.load %arg9[%c0_2, %c0_3] : memref<8x32xf32, #tpu.memory_space<vmem>>, vector<8x32xf32>
    %c0_4 = arith.constant 0 : index
    %c0_5 = arith.constant 0 : index
    %5 = vector.load %arg4[%c0_4, %c0_5] : memref<32x32xf32, #tpu.memory_space<vmem>>, vector<32x32xf32>
    %cst = arith.constant dense<0.000000e+00> : vector<8x32xf32>
    %6 = tpu.matmul %3, %5, %cst {dimension_numbers = #tpu.dot_dimension_numbers<[1], [1], [0], [0], [0, 0, 1, 0], [], []>} : vector<8x32xf32>, vector<32x32xf32>, vector<8x32xf32> -> vector<8x32xf32>
    %7 = arith.addf %4, %6 : vector<8x32xf32>
    %c0_6 = arith.constant 0 : index
    %c0_7 = arith.constant 0 : index
    %8 = vector.load %arg9[%c0_6, %c0_7] : memref<8x32xf32, #tpu.memory_space<vmem>>, vector<8x32xf32>
    tpu.vector_store %arg9[%c0_6, %c0_7], %7 {strides = array<i32>} : memref<8x32xf32, #tpu.memory_space<vmem>>, vector<8x32xf32>,
    %c0_8 = arith.constant 0 : index
    %c0_9 = arith.constant 0 : index
    %9 = vector.load %arg10[%c0_8, %c0_9] : memref<8x8xf32, #tpu.memory_space<vmem>>, vector<8x8xf32>
    %c0_10 = arith.constant 0 : index
    %c0_11 = arith.constant 0 : index
    %10 = vector.load %arg6[%c0_10, %c0_11] : memref<8x32xf32, #tpu.memory_space<vmem>>, vector<8x32xf32>
    %cst_12 = arith.constant dense<0.000000e+00> : vector<8x8xf32>
    %11 = tpu.matmul %3, %10, %cst_12 {dimension_numbers = #tpu.dot_dimension_numbers<[1], [1], [0], [0], [0, 0, 1, 0], [], []>} : vector<8x32xf32>, vector<8x32xf32>, vector<8x8xf32> -> vector<8x8xf32>
    %12 = arith.addf %9, %11 : vector<8x8xf32>
    %c0_13 = arith.constant 0 : index
    %c0_14 = arith.constant 0 : index
    %13 = vector.load %arg10[%c0_13, %c0_14] : memref<8x8xf32, #tpu.memory_space<vmem>>, vector<8x8xf32>
    tpu.vector_store %arg10[%c0_13, %c0_14], %12 {strides = array<i32>} : memref<8x8xf32, #tpu.memory_space<vmem>>, vector<8x8xf32>,
    %c0_i32_15 = arith.constant 0 : i32
    %14 = arith.cmpi eq, %arg2, %c0_i32_15 : i32
    %15 = arith.extui %14 : i1 to i32
    %c0_i32_16 = arith.constant 0 : i32
    %16 = arith.cmpi ne, %15, %c0_i32_16 : i32
    scf.if %16 {
      %c0_17 = arith.constant 0 : index
      %c0_18 = arith.constant 0 : index
      %17 = vector.load %arg10[%c0_17, %c0_18] : memref<8x8xf32, #tpu.memory_space<vmem>>, vector<8x8xf32>
      %c0_19 = arith.constant 0 : index
      %c0_20 = arith.constant 0 : index
      %18 = vector.load %arg7[%c0_19, %c0_20] : memref<8x32xf32, #tpu.memory_space<vmem>>, vector<8x32xf32>
      %cst_21 = arith.constant dense<0.000000e+00> : vector<8x32xf32>
      %19 = tpu.matmul %17, %18, %cst_21 {dimension_numbers = #tpu.dot_dimension_numbers<[1], [0], [0], [1], [0, 0, 1, 1], [], []>} : vector<8x8xf32>, vector<8x32xf32>, vector<8x32xf32> -> vector<8x32xf32>
      %c0_22 = arith.constant 0 : index
      %c0_23 = arith.constant 0 : index
      %20 = vector.load %arg9[%c0_22, %c0_23] : memref<8x32xf32, #tpu.memory_space<vmem>>, vector<8x32xf32>
      %21 = arith.addf %20, %19 : vector<8x32xf32>
      %c0_24 = arith.constant 0 : index
      %c0_25 = arith.constant 0 : index
      %22 = vector.load %arg5[%c0_24, %c0_25] : memref<1x32xf32, #tpu.memory_space<vmem>>, vector<1x32xf32>
      %23 = vector.broadcast %22 : vector<1x32xf32> to vector<8x32xf32>
      %24 = arith.addf %21, %23 : vector<8x32xf32>
      %c0_26 = arith.constant 0 : index
      %c0_27 = arith.constant 0 : index
      %25 = vector.load %arg8[%c0_26, %c0_27] : memref<8x32xf32, #tpu.memory_space<vmem>>, vector<8x32xf32>
      tpu.vector_store %arg8[%c0_26, %c0_27], %24 {strides = array<i32>} : memref<8x32xf32, #tpu.memory_space<vmem>>, vector<8x32xf32>,
    } else {
    }
    return
  }
  func.func @transform_0(%arg0: i32, %arg1: i32, %arg2: i32) -> (i32, i32) {
    %c0_i32 = arith.constant 0 : i32
    return %arg0, %arg2 : i32, i32
  }
  func.func @transform_1(%arg0: i32, %arg1: i32, %arg2: i32) -> (i32, i32) {
    %c0_i32 = arith.constant 0 : i32
    return %arg1, %arg2 : i32, i32
  }
  func.func @transform_2(%arg0: i32, %arg1: i32, %arg2: i32) -> (i32, i32) {
    %c0_i32 = arith.constant 0 : i32
    %c0_i32_0 = arith.constant 0 : i32
    return %c0_i32, %arg1 : i32, i32
  }
  func.func @transform_3(%arg0: i32, %arg1: i32, %arg2: i32) -> (i32, i32) {
    %c0_i32 = arith.constant 0 : i32
    %c0_i32_0 = arith.constant 0 : i32
    return %c0_i32, %arg2 : i32, i32
  }
  func.func @transform_4(%arg0: i32, %arg1: i32, %arg2: i32) -> (i32, i32) {
    %c0_i32 = arith.constant 0 : i32
    %c0_i32_0 = arith.constant 0 : i32
    return %c0_i32, %arg1 : i32, i32
  }
  func.func @transform_5(%arg0: i32, %arg1: i32, %arg2: i32) -> (i32, i32) {
    %c0_i32 = arith.constant 0 : i32
    return %arg0, %arg1 : i32, i32
  }
}

</mosaic_0001>

<bundles_post_ra>
// kernel: tpu_custom_call.1
= control target key start
LH: loop header
LB: loop body
LE: loop exit
PB: predicated region body
PF: predicated region fallthrough
CT: control target
= control target key end

     0   :  { %10 = vsyncpa [#allocation5], 0  ;;  %s600_s0 = inlined_call_operand.hbm [shape: f32[8,32], index: 0, kind: input, shape index: {}]   ;;  %s601_s1 = inlined_call_operand.hbm [shape: f32[32,32], index: 1, kind: input, shape index: {}]   ;;  %s602_s2 = inlined_call_operand.vmem [shape: f32[1,32], index: 2, kind: input, shape index: {}]   ;;  %s603_s3 = inlined_call_operand.vmem [shape: f32[8,32], index: 3, kind: input, shape index: {}]   ;;  %s604_s4 = inlined_call_operand.hbm [shape: f32[8,32], index: 4, kind: input, shape index: {}]   ;;  %s605_s5 = inlined_call_operand.hbm [shape: f32[8,32], index: 5, kind: output, shape index: {}]  }
   0x1   :  { %11 = vsyncpa [#allocation8], 0 }
   0x2   :  { %12 = vsyncpa [#allocation6], 0  ;;  %s493_s18 = smov [#allocation7]   ;;  %s399_s22 = scalar_lea.hbm %s601_s1, 512 }
   0x3   :  { %s28_s19 = sshll.u32 %s493_s18, 4  ;;  %p400_p0 = scmp.ne.s32.totalorder %s601_s1, %s399_s22  ;;  %s29_s19 = int_to_ptr.vmem [resolvable:$true] %s28_s19 }
   0x4   :  { %p403_p1 = scmp.lt.u32.totalorder %s399_s22, %s601_s1 }
   0x6   :  { %p405_p2 = pnand %p403_p1, %p400_p0 }
   0x8   :  { %408 = shalt.err (!%p405_p2)
}
   0x9   :  { %s409_s27 = scalar_lea.vmem %s29_s19, 512  ;;  %p414_p4 = scmp.lt.s32.totalorder %s29_s19, %s29_s19 }
   0xa   :  { %p410_p3 = scmp.ne.s32.totalorder %s29_s19, %s409_s27  ;;  %p415_p5 = scmp.lt.s32.totalorder %s409_s27, %s409_s27 }
   0xc   :  { %p416_p6 = por %p415_p5, %p414_p4 }
   0xe   :  { %p417_p7 = pnand %p416_p6, %p410_p3 }
  0x10   :  { %420 = shalt.err (!%p417_p7)
}
  0x11   :  { %s494_s28 = smov 128   ;;  %s495_s29 = smov 8  }
  0x12   :  { %34 = dma.hbm_to_vmem [thread:$0]  %s601_s1, 512, %s29_s19, [#allocation8], %s494_s28, %s494_s28, %s495_s29  }
  0x13   :  { %s496_s7 = smov [#allocation4]   ;;  %s497_s9 = smov [#allocation9]  }
  0x14   :  { %s19_s8 = sshll.u32 %s496_s7, 4  ;;  %s45_s10 = sshll.u32 %s497_s9, 4  ;;  %s20_s8 = int_to_ptr.vmem [resolvable:$true] %s19_s8  ;;  %s46_s10 = int_to_ptr.vmem [resolvable:$true] %s45_s10 }
  0x15   :  { %s421_s13 = scalar_lea.hbm %s600_s0, 128 }
  0x16   :  { %p422_p8 = scmp.ne.s32.totalorder %s600_s0, %s421_s13  ;;  %p425_p9 = scmp.lt.u32.totalorder %s421_s13, %s600_s0 }
  0x18   :  { %p427_p10 = pnand %p425_p9, %p422_p8 }
  0x1a   :  { %430 = shalt.err (!%p427_p10)
}
  0x1b   :  { %s431_s1 = scalar_lea.vmem %s20_s8, 128  ;;  %p436_p12 = scmp.lt.s32.totalorder %s20_s8, %s20_s8 }
  0x1c   :  { %p432_p11 = scmp.ne.s32.totalorder %s20_s8, %s431_s1  ;;  %p437_p13 = scmp.lt.s32.totalorder %s431_s1, %s431_s1 }
  0x1e   :  { %p438_p0 = por %p437_p13, %p436_p12 }
  0x20   :  { %p439_p1 = pnand %p438_p0, %p432_p11 }
  0x22   :  { %442 = shalt.err (!%p439_p1)
}
  0x23   :  { %22 = dma.hbm_to_vmem [thread:$0]  %s600_s0, 128, %s20_s8, [#allocation5]  }
  0x24   :  { %s443_s22 = scalar_lea.hbm %s604_s4, 128 }
  0x25   :  { %p444_p2 = scmp.ne.s32.totalorder %s604_s4, %s443_s22  ;;  %p447_p3 = scmp.lt.u32.totalorder %s443_s22, %s604_s4 }
  0x27   :  { %p449_p4 = pnand %p447_p3, %p444_p2 }
  0x29   :  { %452 = shalt.err (!%p449_p4)
}
  0x2a   :  { %s453_s27 = scalar_lea.vmem %s46_s10, 128  ;;  %p458_p6 = scmp.lt.s32.totalorder %s46_s10, %s46_s10 }
  0x2b   :  { %p454_p5 = scmp.ne.s32.totalorder %s46_s10, %s453_s27  ;;  %p459_p7 = scmp.lt.s32.totalorder %s453_s27, %s453_s27 }
  0x2d   :  { %p460_p8 = por %p459_p7, %p458_p6 }
  0x2f   :  { %p461_p9 = pnand %p460_p8, %p454_p5 }
  0x31   :  { %464 = shalt.err (!%p461_p9)
}
  0x32   :  { %48 = dma.hbm_to_vmem [thread:$0]  %s604_s4, 128, %s46_s10, [#allocation8]  }
  0x33   :  { %487 = dma.done.wait [#allocation5], 128  }
  0x34   :  { %488 = vsyncadd [#allocation5], 4294967168 }
  0x35   :  { %489 = dma.done.wait [#allocation8], 640  }
  0x36   :  { %490 = vsyncadd [#allocation8], 4294966656  ;;  %vm62_vm0 = vcmask 261120   ;;  %v498_v0 = vmov 0.0   ;;  %vm499_vm1 = vmmov 0   ;;  %vm64_vm2 = vcmask 64512  }
  0x37   :  { %372 = vmatprep.subr.mxu1 %v498_v0  ;;  %63 = vst.msk [vmem:[#allocation2] sm:$0xff] %vm62_vm0, %v498_v0  ;;  %374 = vmatprep.mubr.msk.f32.mxu1 %vm499_vm1, %v498_v0  ;;  %v500_v1 = vmov 0.0|0.0   ;;  %v161_v2 = vld [vmem:[%s603_s3] sm:$0xff]  ;;  %v68_v3 = vld [vmem:[#allocation7] sm:$0xff]  ;;  %v66_v4 = vld [vmem:[#allocation4] sm:$0xff]  ;;  %s501_s6 = smov [#allocation10]  }
  0x38   :  { %382 = vmatprep.subr.bf16.mxu0 %v500_v1  ;;  %369 = vmatprep.mubr.msk.f32.mxu0 %vm499_vm1, %v498_v0  ;;  %65 = vst.msk [vmem:[#allocation3] sm:$0xff] %vm64_vm2, %v498_v0  ;;  %v69_v5 = vld [vmem:[#allocation7 + $0x8] sm:$0xff]  ;;  %vm384_vm3 = vmpackc.low %vm62_vm0, %vm62_vm0  ;;  %v70_v7 = vld [vmem:[#allocation7 + $0x10] sm:$0xff]  ;;  %s333_s7 = sshll.u32 %s501_s6, 4  ;;  %s334_s7 = int_to_ptr.vmem [resolvable:$true] %s333_s7 }
  0x39   :  { %373 = vmatpush3.xpose.msk.msra.mxu1 %vm62_vm0, %v161_v2  ;;  %v383_v6 = vpack.c.bf16 %v69_v5, %v68_v3  ;;  %v71_v8 = vld [vmem:[#allocation7 + $0x18] sm:$0xff]  ;;  %v242_v10 = vld [vmem:[#allocation9] sm:$0xff]  ;;  %v351_v22 = vld [vmem:[%s602_s2] ss:$0 sm:$0xff]  ;;  %s465_s8 = scalar_lea.vmem %s334_s7, 128  ;;  %p470_p11 = scmp.lt.s32.totalorder %s334_s7, %s334_s7 }
  0x3a   :  { %377 = vmatprep.subr.mxu1 %v498_v0  ;;  %v387_v9 = vpack.c.bf16 %v71_v8, %v70_v7  ;;  %p466_p10 = scmp.ne.s32.totalorder %s334_s7, %s465_s8  ;;  %p471_p12 = scmp.lt.s32.totalorder %s465_s8, %s465_s8 }
  0x3b   :  { %385 = vmatpush3.bf16.xpose.msk.msra.mxu0 %vm384_vm3, %v383_v6 }
  0x3c   :  { %375 = vmatmul.mubr.msk.f32.vlgmr.msra.gmra.mrb[0].mxu1 %vm62_vm0, %v66_v4  ;;  %386 = vmatprep.subr.bf16.mxu0 %v500_v1  ;;  %p472_p13 = por %p471_p12, %p470_p11 }
  0x3d   :  { %379 = vmatprep.mubr.msk.f32.mxu1 %vm499_vm1, %v498_v0  ;;  %378 = vmatpush3.msra.mxu1 %v242_v10 }
  0x3e   :  { %v67_v16 = vld [vmem:[#allocation2] sm:$0xff]  ;;  %p473_p0 = pnand %p472_p13, %p466_p10 }
  0x3f   :  { %v160_v11 = vld [vmem:[#allocation3] sm:$0xff] }
  0x43   :  { %389 = vmatpush3.bf16.xpose.msk.msra.mxu0 %vm384_vm3, %v387_v9 }
  0x4a   :  { %370 = vmatmul.mubr.msk.f32.vlgmr.msra.gmra.mrb[0].mxu0 %vm62_vm0, %v66_v4 }
 0x10f   :  { %v231_v12 = vpop.f32.mrb[0].mxu1 }
 0x110   :  { %v235_v13 = vadd.f32 %v231_v12, %v160_v11  ;;  %v376_v14 = vpop.f32.mrb[1].mxu1 }
 0x112   :  { %237 = vst.msk [vmem:[#allocation3] sm:$0xff] %vm64_vm2, %v235_v13 }
 0x119   :  { %v241_v15 = vld [vmem:[#allocation3] sm:$0xff] }
 0x11a   :  { %380 = vmatmul.mubr.msk.f32.vlgmr.msra.gmra.mrb[2].mxu1 %vm64_vm2, %v241_v15 }
 0x11d   :  { %v154_v17 = vpop.f32.mrb[0].mxu0 }
 0x11e   :  { %v158_v18 = vadd.f32 %v154_v17, %v67_v16  ;;  %v371_v19 = vpop.f32.mrb[1].mxu0 }
 0x120   :  { %159 = vst.msk [vmem:[#allocation2] sm:$0xff] %vm62_vm0, %v158_v18 }
 0x127   :  { %v316_v20 = vld [vmem:[#allocation2] sm:$0xff] }
 0x1ed   :  { %v312_v21 = vpop.f32.mrb[2].mxu1 }
 0x1ee   :  { %v317_v23 = vadd.f32 %v316_v20, %v312_v21  ;;  %v381_v24 = vpop.f32.mrb[3].mxu1 }
 0x1f0   :  { %v325_v25 = vadd.f32 %v351_v22, %v317_v23 }
 0x1f2   :  { %326 = vst.msk [vmem:[#allocation10] sm:$0xff] %vm62_vm0, %v325_v25 }
 0x1f3   :  { %476 = shalt.err (!%p473_p0)
}
 0x1f4   :  { %s477_s11 = scalar_lea.hbm %s605_s5, 128 }
 0x1f5   :  { %p478_p1 = scmp.ne.s32.totalorder %s605_s5, %s477_s11  ;;  %p481_p2 = scmp.lt.u32.totalorder %s477_s11, %s605_s5 }
 0x1f7   :  { %p483_p3 = pnand %p481_p2, %p478_p1 }
 0x1f9   :  { %486 = shalt.err (!%p483_p3)
}
 0x1fa   :  { %336 = dma.vmem_to_hbm [thread:$0]  %s334_s7, 128, %s605_s5, [#allocation6]  }
 0x1fb   :  { %491 = dma.done.wait [#allocation6], 128  }
 0x1fc   :  { %492 = vsyncadd [#allocation6], 4294967168 }
 0x1fd   :  { %340 = vsyncpa [#allocation5], 1 }
 0x1fe   :  { %341 = vsyncpa [#allocation8], 1 }
 0x1ff   :  { %342 = vsyncpa [#allocation6], 1 }

</bundles_post_ra>
